<compile_context>
chip_gen: v7x
topology: tpu7x:2x2x1
jax: 0.10.0
libtpu: 0.0.40
codegen_flags: <defaults>
</compile_context>

<pallas_src>
import math

import jax
import jax.numpy as jnp
from jax.experimental import pallas as pl
from jax.experimental.pallas import tpu as pltpu


def _layer_norm(x, gamma, beta, eps=1e-5):
    # LayerNorm over last dim, biased variance (matches nn.LayerNorm), f32 math.
    mu = jnp.mean(x, axis=-1, keepdims=True)
    var = jnp.mean((x - mu) ** 2, axis=-1, keepdims=True)
    return (x - mu) * jax.lax.rsqrt(var + eps) * gamma + beta


# --------------------------------------------------------------------------
# Kernel 1: fused Q|K|V projection (one wide matmul, bf16 operands, f32 acc),
# tiled over (batch, sequence-tile) so DMA/compute overlap within a batch.
# --------------------------------------------------------------------------
def qkv_proj_kernel(x_ref, w_ref, b_ref, qkv_ref):
    x = x_ref[0].astype(jnp.bfloat16)                                  # (TS, D)
    y = jnp.dot(x, w_ref[...], preferred_element_type=jnp.float32) + b_ref[...]
    qkv_ref[0] = y.astype(qkv_ref.dtype)                               # bf16 out


def qkv_projection(x, wqkv, bqkv, *, ts=None):
    B, S, D = x.shape
    N = wqkv.shape[1]
    if ts is None:
        if S % 256 == 0:
            ts = 256
        elif S % 128 == 0:
            ts = 128
        else:
            ts = S          # small / non-aligned sequences: one full-S tile
    n_st = S // ts
    return pl.pallas_call(
        qkv_proj_kernel,
        out_shape=jax.ShapeDtypeStruct((B, S, N), jnp.bfloat16),
        grid_spec=pltpu.PrefetchScalarGridSpec(
            num_scalar_prefetch=0,
            grid=(B, n_st),
            in_specs=[
                pl.BlockSpec((1, ts, D), lambda b, si: (b, si, 0)),
                pl.BlockSpec(wqkv.shape, lambda b, si: (0, 0)),
                pl.BlockSpec(bqkv.shape, lambda b, si: (0, 0)),
            ],
            out_specs=pl.BlockSpec((1, ts, N), lambda b, si: (b, si, 0)),
        ),
        compiler_params=pltpu.CompilerParams(
            dimension_semantics=("parallel", "parallel"),
            vmem_limit_bytes=48 * 1024 * 1024,
        ),
    )(x, wqkv, bqkv)


# --------------------------------------------------------------------------
# Kernel 2: batched-head attention + output projection + LN + FFN + LN,
# tiled over (batch, query-tile).  K arrives pre-transposed as (H, d_k, S).
# --------------------------------------------------------------------------
def attn_ffn_kernel(q_ref, k_ref, v_ref, x_ref,
                    wo_ref, bo_ref, g1_ref, be1_ref,
                    w1_ref, b1_ref, w2_ref, b2_ref, g2_ref, be2_ref,
                    out_ref, attn_ref):
    q = q_ref[0]            # (H, TQ, d_k) bf16, 1/sqrt(d_k) already folded in
    kT = k_ref[0]           # (H, d_k, S)  bf16 (pre-transposed: no MXU-front XLU transpose)
    v = v_ref[0]            # (H, S,  d_v) bf16
    x = x_ref[0]            # (TQ, D)      f32 residual

    # Scaled dot-product attention, all heads batched on the MXU.
    scores = jnp.einsum('hqd,hdk->hqk', q, kT,
                        preferred_element_type=jnp.float32)            # (H,TQ,S) f32
    # TODO(synk): enc_self_attn_mask is None in this forward; masked_fill(-1e9) path omitted.
    m = jnp.max(scores, axis=-1, keepdims=True)
    e = jnp.exp(scores - m)                                            # f32 exp (v5e-safe)
    p = e * pl.reciprocal(jnp.sum(e, axis=-1, keepdims=True), approx=True)
    p_bf = p.astype(jnp.bfloat16)
    attn_ref[0] = p_bf.astype(attn_ref.dtype)                          # bf16 HBM write

    ctx = jnp.einsum('hqk,hkd->hqd', p_bf, v,
                     preferred_element_type=jnp.float32)               # (H,TQ,d_v) f32

    # Output projection as ONE deep-K matmul: concat(heads) -> (TQ, H*d_v), then @ Wo.
    H = ctx.shape[0]
    ctx_flat = jnp.concatenate([ctx[h] for h in range(H)], axis=-1)    # (TQ, H*d_v)
    o = jnp.dot(ctx_flat.astype(jnp.bfloat16), wo_ref[...],
                preferred_element_type=jnp.float32) + bo_ref[...]      # (TQ, D)
    attn_out = _layer_norm(o + x, g1_ref[...], be1_ref[...])           # residual + LN

    # Position-wise FFN (1x1 convs == per-position linears), bf16 matmuls, f32 acc.
    h1 = jnp.maximum(
        jnp.dot(attn_out.astype(jnp.bfloat16), w1_ref[...],
                preferred_element_type=jnp.float32) + b1_ref[...], 0.0)
    h2 = jnp.dot(h1.astype(jnp.bfloat16), w2_ref[...],
                 preferred_element_type=jnp.float32) + b2_ref[...]
    out_ref[0] = _layer_norm(h2 + attn_out, g2_ref[...], be2_ref[...]).astype(out_ref.dtype)


def encoder_layer(x, params, *, d_k, d_v, n_heads, tq=None,
                  attn_dtype=jnp.bfloat16):
    B, S, D = x.shape
    (wq, bq, wk, bk, wv, bv, wo, bo, g1, be1, w1, b1, w2, b2, g2, be2) = params
    H = n_heads

    # Fold 1/sqrt(d_k) into the Q projection; fuse Q|K|V into one wide matmul.
    scale = 1.0 / math.sqrt(d_k)
    wqkv = jnp.concatenate([wq * scale, wk, wv], axis=1).astype(jnp.bfloat16)
    bqkv = jnp.concatenate([bq * scale, bk, bv], axis=1).astype(jnp.float32)

    qkv = qkv_projection(x, wqkv, bqkv)                  # (B, S, H*(2*d_k+d_v)) bf16

    # Wrapper-side layout plumbing (plain XLA): split heads; K is transposed to
    # (B,H,d_k,S) so the score matmul is the canonical (TQ,d_k)@(d_k,S) form and
    # the K tile is lane-dense along S.  Only the permutation differs from before.
    hk = H * d_k
    q4 = qkv[..., :hk].reshape(B, S, H, d_k).transpose(0, 2, 1, 3)        # (B,H,S,d_k)
    kT = qkv[..., hk:2 * hk].reshape(B, S, H, d_k).transpose(0, 2, 3, 1)  # (B,H,d_k,S)
    v4 = qkv[..., 2 * hk:].reshape(B, S, H, d_v).transpose(0, 2, 1, 3)    # (B,H,S,d_v)

    # Query-tile size: full S when small, else 128 (multiple of the MXU M tile;
    # raise to 256 on 128-MiB-VMEM parts if K/V + attn block still fit).
    if tq is None:
        tq = S if S <= 256 else 128
    tq = min(tq, S)
    n_qt = pl.cdiv(S, tq)
    S_pad = n_qt * tq

    # Pad the QUERY axis only (keys stay unpadded, so softmax is unchanged);
    # padded rows are sliced off after the call.
    if S_pad != S:
        pad = S_pad - S
        q4 = jnp.pad(q4, ((0, 0), (0, 0), (0, pad), (0, 0)))
        x_res = jnp.pad(x, ((0, 0), (0, pad), (0, 0)))
    else:
        x_res = x

    wo_b = wo.astype(jnp.bfloat16)                       # (H*d_v, D) kept 2-D: deep-K matmul
    w1b = w1.astype(jnp.bfloat16)
    w2b = w2.astype(jnp.bfloat16)
    wparams = [wo_b, bo, g1, be1, w1b, b1, w2b, b2, g2, be2]

    def _const_spec(p):
        nd = p.ndim
        return pl.BlockSpec(p.shape, lambda b, qi, _nd=nd: (0,) * _nd)

    in_specs = [
        pl.BlockSpec((1, H, tq, d_k), lambda b, qi: (b, 0, qi, 0)),   # q tile
        pl.BlockSpec((1, H, d_k, S), lambda b, qi: (b, 0, 0, 0)),     # full K^T
        pl.BlockSpec((1, H, S, d_v), lambda b, qi: (b, 0, 0, 0)),     # full V
        pl.BlockSpec((1, tq, D), lambda b, qi: (b, qi, 0)),           # residual x tile
    ] + [_const_spec(p) for p in wparams]

    out_specs = [
        pl.BlockSpec((1, tq, D), lambda b, qi: (b, qi, 0)),
        pl.BlockSpec((1, H, tq, S), lambda b, qi: (b, 0, qi, 0)),
    ]
    out_shape = (
        jax.ShapeDtypeStruct((B, S_pad, D), jnp.float32),
        jax.ShapeDtypeStruct((B, H, S_pad, S), attn_dtype),           # bf16 attn write
    )
    enc_out, attn = pl.pallas_call(
        attn_ffn_kernel,
        out_shape=out_shape,
        grid_spec=pltpu.PrefetchScalarGridSpec(
            num_scalar_prefetch=0,
            grid=(B, n_qt),
            in_specs=in_specs,
            out_specs=out_specs,
        ),
        compiler_params=pltpu.CompilerParams(
            dimension_semantics=("parallel", "parallel"),
            vmem_limit_bytes=48 * 1024 * 1024,
        ),
    )(q4, kT, v4, x_res, *wparams)

    if S_pad != S:
        enc_out = enc_out[:, :S]
        attn = attn[:, :, :S]
    return enc_out, attn


# --------------------------------------------------------------------------
# Pure-JAX reference (f32) for a sanity check.
# --------------------------------------------------------------------------
def encoder_layer_reference(x, params, *, d_k, d_v, n_heads):
    (wq, bq, wk, bk, wv, bv, wo, bo, g1, be1, w1, b1, w2, b2, g2, be2) = params
    B, S, D = x.shape
    H = n_heads
    q = (x @ wq + bq).reshape(B, S, H, d_k).transpose(0, 2, 1, 3)
    k = (x @ wk + bk).reshape(B, S, H, d_k).transpose(0, 2, 1, 3)
    v = (x @ wv + bv).reshape(B, S, H, d_v).transpose(0, 2, 1, 3)
    scores = jnp.einsum('bhqd,bhkd->bhqk', q, k) / math.sqrt(d_k)
    attn = jax.nn.softmax(scores, axis=-1)
    ctx = jnp.einsum('bhqk,bhkd->bhqd', attn, v).transpose(0, 2, 1, 3).reshape(B, S, H * d_v)
    o = ctx @ wo + bo
    a_out = _layer_norm(o + x, g1, be1)
    h1 = jnp.maximum(a_out @ w1 + b1, 0.0)
    h2 = h1 @ w2 + b2
    return _layer_norm(h2 + a_out, g2, be2), attn


def init_params(key, d_model, d_k, d_v, d_ff, n_heads):
    ks = jax.random.split(key, 12)
    s = 0.05
    wq = jax.random.normal(ks[0], (d_model, n_heads * d_k), jnp.float32) * s
    bq = jax.random.normal(ks[1], (1, n_heads * d_k), jnp.float32) * s
    wk = jax.random.normal(ks[2], (d_model, n_heads * d_k), jnp.float32) * s
    bk = jax.random.normal(ks[3], (1, n_heads * d_k), jnp.float32) * s
    wv = jax.random.normal(ks[4], (d_model, n_heads * d_v), jnp.float32) * s
    bv = jax.random.normal(ks[5], (1, n_heads * d_v), jnp.float32) * s
    wo = jax.random.normal(ks[6], (n_heads * d_v, d_model), jnp.float32) * s
    bo = jax.random.normal(ks[7], (1, d_model), jnp.float32) * s
    g1 = jnp.ones((1, d_model), jnp.float32)
    be1 = jnp.zeros((1, d_model), jnp.float32)
    # Conv1d(d_model -> d_ff, k=1) and Conv1d(d_ff -> d_model, k=1) as matmuls.
    w1 = jax.random.normal(ks[8], (d_model, d_ff), jnp.float32) * s
    b1 = jax.random.normal(ks[9], (1, d_ff), jnp.float32) * s
    w2 = jax.random.normal(ks[10], (d_ff, d_model), jnp.float32) * s
    b2 = jax.random.normal(ks[11], (1, d_model), jnp.float32) * s
    g2 = jnp.ones((1, d_model), jnp.float32)
    be2 = jnp.zeros((1, d_model), jnp.float32)
    return [wq, bq, wk, bk, wv, bv, wo, bo, g1, be1, w1, b1, w2, b2, g2, be2]


if __name__ == "__main__":
    # Small deterministic shapes consistent with EncoderLayer's forward.
    B, S = 2, 8
    d_model, d_k, d_v, d_ff, n_heads = 32, 8, 8, 64, 4

    key = jax.random.PRNGKey(0)
    kx, kp = jax.random.split(key)
    x = jax.random.normal(kx, (B, S, d_model), jnp.float32)
    params = init_params(kp, d_model, d_k, d_v, d_ff, n_heads)

    enc_out, attn = encoder_layer(x, params, d_k=d_k, d_v=d_v, n_heads=n_heads)
    jax.block_until_ready((enc_out, attn))

    assert enc_out.shape == (B, S, d_model)
    assert attn.shape == (B, n_heads, S, S)
    assert bool(jnp.all(jnp.isfinite(enc_out))) and bool(jnp.all(jnp.isfinite(attn)))

    # Sanity check against the pure-JAX f32 reference (bf16 matmuls / bf16 attn -> loose tol).
    ref_out, ref_attn = encoder_layer_reference(x, params, d_k=d_k, d_v=d_v, n_heads=n_heads)
    assert bool(jnp.allclose(enc_out, ref_out, atol=5e-2, rtol=5e-2))
    assert bool(jnp.allclose(attn.astype(jnp.float32), ref_attn, atol=5e-2, rtol=5e-2))

    print("KERNEL_OK")
</pallas_src>

<mosaic_0001>
module attributes {stable_mosaic.version = 11 : i64} {
  func.func @qkv_proj_kernel(%arg0: i32, %arg1: i32, %arg2: memref<1x8x32xf32, #tpu.memory_space<vmem>>, %arg3: memref<32x96xbf16, #tpu.memory_space<vmem>>, %arg4: memref<1x96xf32, #tpu.memory_space<vmem>>, %arg5: memref<1x8x96xbf16, #tpu.memory_space<vmem>>) attributes {dimension_semantics = [#tpu.dimension_semantics<parallel>, #tpu.dimension_semantics<parallel>], iteration_bounds = array<i64: 2, 1>, scalar_prefetch = 0 : i64, scratch_operands = 0 : i64, tpu.core_type = #tpu.core_type<tc>, window_params = [{transform_indices = @transform_0, window_bounds = array<i64: 1, 8, 32>}, {pipeline_mode = #tpu.pipeline_mode<synchronous>, transform_indices = @transform_1, window_bounds = array<i64: 32, 96>}, {pipeline_mode = #tpu.pipeline_mode<synchronous>, transform_indices = @transform_2, window_bounds = array<i64: 1, 96>}, {transform_indices = @transform_3, window_bounds = array<i64: 1, 8, 96>}]} {
    %c0 = arith.constant 0 : index
    %c0_0 = arith.constant 0 : index
    %c0_1 = arith.constant 0 : index
    %0 = vector.load %arg2[%c0, %c0_0, %c0_1] : memref<1x8x32xf32, #tpu.memory_space<vmem>>, vector<1x8x32xf32>
    %1 = vector.shape_cast %0 : vector<1x8x32xf32> to vector<8x32xf32>
    %2 = arith.truncf %1 : vector<8x32xf32> to vector<8x32xbf16>
    %c0_2 = arith.constant 0 : index
    %c0_3 = arith.constant 0 : index
    %3 = vector.load %arg3[%c0_2, %c0_3] : memref<32x96xbf16, #tpu.memory_space<vmem>>, vector<32x96xbf16>
    %cst = arith.constant dense<0.000000e+00> : vector<8x96xf32>
    %4 = tpu.matmul %2, %3, %cst {dimension_numbers = #tpu.dot_dimension_numbers<[1], [0], [0], [1], [0, 0, 1, 1], [], []>} : vector<8x32xbf16>, vector<32x96xbf16>, vector<8x96xf32> -> vector<8x96xf32>
    %c0_4 = arith.constant 0 : index
    %c0_5 = arith.constant 0 : index
    %5 = vector.load %arg4[%c0_4, %c0_5] : memref<1x96xf32, #tpu.memory_space<vmem>>, vector<1x96xf32>
    %6 = vector.broadcast %5 : vector<1x96xf32> to vector<8x96xf32>
    %7 = arith.addf %4, %6 : vector<8x96xf32>
    %8 = arith.truncf %7 : vector<8x96xf32> to vector<8x96xbf16>
    %c0_6 = arith.constant 0 : index
    %c0_7 = arith.constant 0 : index
    %c0_8 = arith.constant 0 : index
    %9 = vector.load %arg5[%c0_6, %c0_7, %c0_8] : memref<1x8x96xbf16, #tpu.memory_space<vmem>>, vector<1x8x96xbf16>
    %10 = vector.shape_cast %9 : vector<1x8x96xbf16> to vector<8x96xbf16>
    %11 = vector.shape_cast %8 : vector<8x96xbf16> to vector<1x8x96xbf16>
    tpu.vector_store %arg5[%c0_6, %c0_7, %c0_8], %11 {strides = array<i32>} : memref<1x8x96xbf16, #tpu.memory_space<vmem>>, vector<1x8x96xbf16>,
    return
  }
  func.func @transform_0(%arg0: i32, %arg1: i32) -> (i32, i32, i32) {
    %c0_i32 = arith.constant 0 : i32
    %c0_i32_0 = arith.constant 0 : i32
    return %arg0, %arg1, %c0_i32 : i32, i32, i32
  }
  func.func @transform_1(%arg0: i32, %arg1: i32) -> (i32, i32) {
    %c0_i32 = arith.constant 0 : i32
    %c0_i32_0 = arith.constant 0 : i32
    %c0_i32_1 = arith.constant 0 : i32
    return %c0_i32, %c0_i32_0 : i32, i32
  }
  func.func @transform_2(%arg0: i32, %arg1: i32) -> (i32, i32) {
    %c0_i32 = arith.constant 0 : i32
    %c0_i32_0 = arith.constant 0 : i32
    %c0_i32_1 = arith.constant 0 : i32
    return %c0_i32, %c0_i32_0 : i32, i32
  }
  func.func @transform_3(%arg0: i32, %arg1: i32) -> (i32, i32, i32) {
    %c0_i32 = arith.constant 0 : i32
    %c0_i32_0 = arith.constant 0 : i32
    return %arg0, %arg1, %c0_i32 : i32, i32, i32
  }
}

</mosaic_0001>

<bundles_post_ra>
// kernel: tpu_custom_call.1
= control target key start
LH: loop header
LB: loop body
LE: loop exit
PB: predicated region body
PF: predicated region fallthrough
CT: control target
= control target key end

     0   :  { %8 = vsyncpa [#allocation3], 0  ;;  %s896_s0 = inlined_call_operand.hbm [shape: f32[2,8,32], index: 0, kind: input, shape index: {}]   ;;  %s897_s1 = inlined_call_operand.hbm [shape: bf16[32,96], index: 1, kind: input, shape index: {}]   ;;  %s898_s2 = inlined_call_operand.vmem [shape: f32[1,96], index: 2, kind: input, shape index: {}]   ;;  %s899_s3 = inlined_call_operand.hbm [shape: bf16[2,8,96], index: 3, kind: output, shape index: {}]  }
   0x1   :  { %10 = vsyncpa [#allocation3 + $0x1], 0 }
   0x2   :  { %11 = vsyncpa [#allocation6], 0 }
   0x3   :  { %12 = vsyncpa [#allocation4], 0 }
   0x4   :  { %14 = vsyncpa [#allocation4 + $0x1], 0  ;;  %s678_s12 = smov 0   ;;  %s680_s13 = smov 0  }
   0x5   :  { %s682_s14 = smov 0   ;;  %s684_s15 = smov 0  }
   0x6   :  { %s686_s16 = smov 0   ;;  %s688_s17 = smov 0  }
   0x7 LB: > { %s396_s18 = sadd.s32 4294967295, %s649_s17   ;;  %s397_s19 = sadd.s32 4294967294, %s649_s17   ;;  %s649_s17 = sphi %s688_s17, %s20_s17   ;;  %s645_s16 = sphi %s686_s16, %s923_s16   ;;  %s641_s15 = sphi %s684_s15, %s922_s15   ;;  %s637_s14 = sphi %s682_s14, %s921_s14   ;;  %s633_s13 = sphi %s680_s13, %s920_s13   ;;  %s629_s12 = sphi %s678_s12, %s919_s12  }
   0x8   : > { %p54_p0 = scmp.ne.s32.totalorder %s633_s13, %s629_s12  ;;  %p712_p1 = scmp.eq.s32.totalorder %s396_s18, 0 }
   0x9   : > { %p716_p2 = scmp.eq.s32.totalorder %s396_s18, 1  ;;  %p128_p3 = scmp.eq.s32.totalorder %s397_s19, 1 }
   0xa   : > { %s904_s20 = scalar_select %p712_p1, 1, 0 }
   0xb   : > { %s905_s21 = scalar_select %p716_p2, 1, 0 }
   0xc   : > { %p722_p4 = por %p712_p1, %p54_p0  ;;  %p398_p5 = scmp.ge.s32.totalorder %s649_s17, 1 }
   0xd   : > { %p727_p6 = por %p128_p3, %p54_p0  ;;  %p135_p7 = scmp.lt.s32.totalorder %s649_s17, 3 }
   0xe   : > { %s906_s22 = scalar_select %p722_p4, 1, 0 }
   0xf   : > { %s907_s23 = scalar_select %p727_p6, 1, 0 }
  0x10   : > { %p732_p8 = pnand %p398_p5, %p135_p7  ;;  %s651_s25 = smov [#allocation5]  }
  0x11   : > { %s147_s26 = sshll.u32 %s651_s25, 4  ;;  %s32_s28 = sadd.s32 1, %s645_s16  ;;  %s148_s26 = int_to_ptr.vmem [resolvable:$true] %s147_s26 }
  0x12   : > { %s908_s24 = scalar_select %p732_p8, 1, 0 }
  0x13   : > { %p434_p9 = pneg %p732_p8  ;;  %s505_s4 = scalar_lea.hbm %s897_s1, 256 }
  0x14   : > { %p506_p12 = scmp.ne.s32.totalorder %s897_s1, %s505_s4  ;;  %p512_p5 = scmp.lt.u32.totalorder %s505_s4, %s897_s1 }
  0x15   : > { %p741_p11 = pnand %p434_p9, %p712_p1 }
  0x17   : > { %p507_p13 = pneg %p741_p11 }
  0x19   : > { %p508_p0 = pnand %p507_p13, %p506_p12 }
  0x1b   : > { %p509_p3 = pneg %p508_p0 }
  0x1d   : > { %p514_p7 = pnand %p512_p5, %p509_p3 }
  0x1f   : > { %517 = shalt.err (!%p514_p7)
}
  0x20   : > { %s518_s9 = scalar_lea.vmem %s148_s26, 256  ;;  %p526_p1 = scmp.lt.s32.totalorder %s148_s26, %s148_s26 }
  0x21   : > { %p519_p9 = scmp.ne.s32.totalorder %s148_s26, %s518_s9  ;;  %p527_p4 = scmp.lt.s32.totalorder %s518_s9, %s518_s9 }
  0x23   : > { %p521_p10 = pnand %p519_p9, %p507_p13  ;;  %p528_p8 = por %p527_p4, %p526_p1 }
  0x25   : > { %p522_p6 = pneg %p521_p10 }
  0x27   : > { %p529_p2 = pnand %p528_p8, %p522_p6 }
  0x29   : > { %532 = shalt.err (!%p529_p2)
}
  0x2a   : > { %s652_s10 = smov 64   ;;  %s653_s11 = smov 4  }
  0x2b   : > { %437 = dma.hbm_to_vmem [thread:$0]  (!%p741_p11), %s897_s1, 256, %s148_s26, [#allocation6], %s652_s10, %s652_s10, %s653_s11  }
  0x2c   : > { %p34_p1 = scmp.ge.s32.totalorder %s32_s28, 2  ;;  %s41_s25 = sadd.s32 1, %s637_s14 }
  0x2d   : > { %p48_p2 = scmp.ne.s32.totalorder %s637_s14, %s633_s13  ;;  %p49_p4 = scmp.eq.s32.totalorder %s649_s17, 0 }
  0x2e   : > { %s925_s28 = smov (%p34_p1, %s32_s28), 0  ;;  %p911_p8 = scmp.ne.s32.totalorder %s905_s21, 0 }
  0x2f   : > { %p768_p6 = por %p49_p4, %p48_p2  ;;  %s36_s27 = ssub.s32 %s645_s16, %s925_s28 }
  0x30   : > { %p774_p10 = por %p911_p8, %p48_p2  ;;  %p447_p12 = scmp.lt.s32.totalorder %s649_s17, 2 }
  0x31   : > { %p39_p11 = scmp.eq.s32.totalorder %s36_s27, 0  ;;  %s164_s26 = sand.u32 1, %s637_s14  }
  0x32   : > { %s401_s4 = sshll.u32 %s164_s26, 3  ;;  %s402_s6 = sshll.u32 %s645_s16, 7 }
  0x33   : > { %s783_s5 = scalar_select %p39_p11, %s637_s14, %s41_s25  }
  0x34   : > { %s789_s9 = scalar_lea.hbm %s896_s0, %s402_s6  ;;  %s168_s21 = scalar_lea.vmem [#allocation2], %s401_s4 }
  0x35   : > { %s176_s10 = sshll.u32 %s168_s21, 4  ;;  %p795_p13 = pnand %p447_p12, %p768_p6  ;;  %s791_s10 = int_to_ptr.vmem [resolvable:$true] %s176_s10 }
  0x36   : > { %s165_s18 = scalar_lea.sflag [#allocation3], %s164_s26  ;;  %s533_s19 = scalar_lea.hbm %s789_s9, 128 }
  0x37   : > { %p534_p0 = scmp.ne.s32.totalorder %s789_s9, %s533_s19  ;;  %p535_p3 = pneg %p795_p13 }
  0x38   : > { %s538_s4 = scalar_lea.hbm %s896_s0, 256  ;;  %p539_p9 = scmp.lt.u32.totalorder %s789_s9, %s896_s0 }
  0x39   : > { %p536_p5 = pnand %p535_p3, %p534_p0  ;;  %p540_p1 = scmp.lt.u32.totalorder %s538_s4, %s533_s19 }
  0x3a   : > { %p542_p4 = scmp.lt.u32.totalorder %s533_s19, %s789_s9 }
  0x3b   : > { %p537_p7 = pneg %p536_p5  ;;  %p541_p2 = por %p540_p1, %p539_p9 }
  0x3d   : > { %p543_p6 = por %p542_p4, %p541_p2 }
  0x3f   : > { %p544_p8 = pnand %p543_p6, %p537_p7 }
  0x41   : > { %547 = shalt.err (!%p544_p8)
}
  0x42   : > { %s548_s26 = scalar_lea.vmem %s791_s10, 128  ;;  %s654_s7 = smov [#allocation2]  }
  0x43   : > { %p549_p12 = scmp.ne.s32.totalorder %s791_s10, %s548_s26  ;;  %s553_s8 = sshll.u32 %s654_s7, 4  ;;  %s554_s8 = int_to_ptr.vmem [resolvable:$false] %s553_s8 }
  0x44   : > { %s555_s21 = scalar_lea.vmem %s554_s8, 256  ;;  %p556_p5 = scmp.lt.s32.totalorder %s791_s10, %s554_s8 }
  0x45   : > { %p551_p11 = pnand %p549_p12, %p535_p3  ;;  %p557_p9 = scmp.lt.s32.totalorder %s555_s21, %s548_s26 }
  0x47   : > { %p552_p0 = pneg %p551_p11  ;;  %p558_p1 = por %p557_p9, %p556_p5 }
  0x49   : > { %p559_p2 = pnand %p558_p1, %p552_p0 }
  0x4b   : > { %562 = shalt.err (!%p559_p2)
}
  0x4c   : > { %441 = dma.hbm_to_vmem [thread:$0]  (!%p795_p13), %s789_s9, 128, %s791_s10, %s165_s18  }
  0x4d   : > { %p914_p7 = scmp.ne.s32.totalorder %s908_s24, 0 }
  0x4e   : > { %s827_s19 = sand.u32 (!%p914_p7), 1, %s633_s13   ;;  %p915_p3 = scmp.ne.s32.totalorder (!%p914_p7), %s906_s22, 0 }
  0x4f   : > { %185 = sbr.rel (%p914_p7) target bundleno = 329 (0x149), region = 32  ;;  %s404_s25 = sshll.u32 (!%p914_p7), %s827_s19, 3 }
  0x50   : > { %s188_s27 = scalar_lea.sflag (!%p914_p7), [#allocation3], %s827_s19  ;;  %s191_s4 = scalar_lea.vmem (!%p914_p7), [#allocation2], %s404_s25 }
  0x56   : > { %616 = dma.done.wait (%p915_p3), %s188_s27, 128  }
  0x57   : > { %618 = vsyncadd (%p915_p3), %s188_s27, 4294967168  ;;  %p916_p4 = scmp.ne.s32.totalorder %s904_s20, 0 }
  0x59   : > { %620 = dma.done.wait (%p916_p4), [#allocation6], 256  }
  0x5a   : > { %622 = vsyncadd (%p916_p4), [#allocation6], 4294967040  ;;  %v655_v0 = vmov 0.0   ;;  %vm656_vm0 = vmmov 0   ;;  %v503_v1 = vld [vmem:[#allocation5] sm:$0xff]   ;;  %v504_v2 = vld [vmem:[#allocation5 + $0x8] sm:$0xff]  }
  0x5b   : > { %418 = vmatprep.subr.bf16.mxu0 %v655_v0  ;;  %422 = vmatprep.mubr.msk.bf16.mxu0 %vm656_vm0, %v655_v0  ;;  %v219_v3 = vld [vmem:[%s191_s4] sm:$0xff]  ;;  %vm244_vm1 = vcmask 261120   ;;  %s406_s22 = sshll.u32 %s827_s19, 2  ;;  %s412_s9 = sshll.u32 %s641_s15, 6  ;;  %vm289_vm2 = vcmask 781312  }
  0x5c   : > { %419 = vmatpush3.bf16.msra.mxu0 %v503_v1  ;;  %v220_v4 = vpack.c.bf16 %v219_v3, %v219_v3  ;;  %v407_v5 = vld [vmem:[%s898_s2] ss:$0 sm:$0xff]  ;;  %s217_s10 = scalar_lea.vmem [#allocation7], %s406_s22  ;;  %s847_s6 = scalar_lea.hbm %s899_s3, %s412_s9 }
  0x5d   : > { %420 = vmatprep.subr.bf16.mxu0 %v655_v0  ;;  %s306_s11 = sshll.u32 %s217_s10, 4  ;;  %s292_s15 = scalar_lea.sflag [#allocation4], %s827_s19  ;;  %s849_s11 = int_to_ptr.vmem [resolvable:$true] %s306_s11 }
  0x5e   : > { %s563_s26 = scalar_lea.vmem %s849_s11, 64  ;;  %s657_s7 = smov [#allocation7]  }
  0x5f   : > { %p564_p13 = scmp.ne.s32.totalorder %s849_s11, %s563_s26  ;;  %s567_s8 = sshll.u32 %s657_s7, 4  ;;  %s568_s8 = int_to_ptr.vmem [resolvable:$false] %s567_s8 }
  0x60   : > { %421 = vmatpush3.bf16.msra.mxu0 %v504_v2  ;;  %s569_s21 = scalar_lea.vmem %s568_s8, 128  ;;  %p570_p12 = scmp.lt.s32.totalorder %s849_s11, %s568_s8 }
  0x61   : > { %p565_p6 = pnand %p564_p13, %p774_p10  ;;  %p571_p11 = scmp.lt.s32.totalorder %s569_s21, %s563_s26 }
  0x63   : > { %423 = vmatmul.mubr.msk.bf16.vlgmr.msra.gmra.mrb[0].mxu0 %vm244_vm1, %v220_v4  ;;  %p566_p8 = pneg %p565_p6  ;;  %p572_p0 = por %p571_p11, %p570_p12 }
  0x65   : > { %p573_p5 = pnand %p572_p0, %p566_p8 }
 0x136   : > { %v282_v6 = vpop.f32.mrb[0].mxu0 }
 0x137   : > { %v283_v7 = vadd.f32 %v407_v5, %v282_v6  ;;  %v424_v8 = vpop.f32.mrb[1].mxu0 }
 0x138   : > { %v285_v9 = vpop.f32.mrb[2].mxu0 }
 0x139   : > { %v288_v10 = vpack.c.bf16 %v283_v7, %v283_v7  ;;  %v425_v11 = vpop.f32.mrb[3].mxu0 }
 0x13b   : > { %290 = vst.msk [vmem:[%s217_s10] sm:$0xf] %vm289_vm2, %v288_v10 }
 0x13c   : > { %576 = shalt.err (!%p573_p5)
}
 0x13d   : > { %s577_s19 = scalar_lea.hbm %s847_s6, 64  ;;  %s581_s4 = scalar_lea.hbm %s899_s3, 128 }
 0x13e   : > { %p578_p9 = scmp.ne.s32.totalorder %s847_s6, %s577_s19  ;;  %p582_p7 = scmp.lt.u32.totalorder %s847_s6, %s899_s3 }
 0x13f   : > { %p583_p3 = scmp.lt.u32.totalorder %s581_s4, %s577_s19  ;;  %p585_p13 = scmp.lt.u32.totalorder %s577_s19, %s847_s6 }
 0x140   : > { %p579_p1 = pnand %p578_p9, %p774_p10 }
 0x141   : > { %p584_p4 = por %p583_p3, %p582_p7 }
 0x142   : > { %p580_p2 = pneg %p579_p1 }
 0x143   : > { %p586_p6 = por %p585_p13, %p584_p4 }
 0x145   : > { %p587_p8 = pnand %p586_p6, %p580_p2 }
 0x147   : > { %590 = shalt.err (!%p587_p8)
}
 0x148   : > { %432 = dma.vmem_to_hbm [thread:$0]  (%p774_p10), %s849_s11, 64, %s847_s6, %s292_s15  }
 0x149 PF: > { %s318_s20 = sand.u32 1, %s629_s12   ;;  %p917_p12 = scmp.ne.s32.totalorder %s907_s23, 0 }
 0x14a   : > { %p918_p11 = scmp.ge.s32.totalorder %s649_s17, 2  ;;  %s319_s9 = scalar_lea.sflag [#allocation4], %s318_s20 }
 0x14c   : > { %p443_p0 = pnand %p918_p11, %p917_p12 }
 0x14e   : > { %624 = dma.done.wait (!%p443_p0), %s319_s9, 64  }
 0x14f   : > { %626 = vsyncadd (!%p443_p0), %s319_s9, 4294967232  ;;  %s20_s17 = sadd.s32 1, %s649_s17   ;;  %s919_s12 = smov %s633_s13 }
 0x150   : > { %p17_p5 = scmp.ge.s32.totalorder %s20_s17, 4   ;;  %s920_s13 = smov %s637_s14 }
 0x151   : > { %s921_s14 = smov %s783_s5  ;;  %s922_s15 = smov %s645_s16 }
 0x152   : > { %s923_s16 = smov %s925_s28  ;;  %19 = sbr.rel (!%p17_p5) target bundleno = 7 (0x7), region = 81 }
 0x159   :  { %324 = vsyncpa [#allocation3], 1 }
 0x15a   :  { %326 = vsyncpa [#allocation3 + $0x1], 1 }
 0x15b   :  { %327 = vsyncpa [#allocation6], 1 }
 0x15c   :  { %328 = vsyncpa [#allocation4], 1 }
 0x15d   :  { %330 = vsyncpa [#allocation4 + $0x1], 1 }

</bundles_post_ra>
